<compile_context>
chip_gen: v5e
topology: v5e:2x2
jax: 0.10.0
libtpu: 0.0.40
codegen_flags: <defaults>
</compile_context>

<pallas_src>
import functools

import jax
import jax.numpy as jnp
from jax.experimental import pallas as pl
from jax.experimental.pallas import tpu as pltpu


LANE = 128
_NEG_BIG = -9e15


# ------------------------------ sizing helpers -------------------------------


def _round_up(x, m):
    return (x + m - 1) // m * m


def _pow2_floor(x):
    p = 1
    while p * 2 <= x:
        p *= 2
    return p


def _tpu_config():
    """(max_row_tile, vmem_limit_bytes) for the current TPU generation."""
    kind = ""
    try:
        kind = jax.devices()[0].device_kind.lower()
    except Exception:
        pass
    vmem_phys = None
    try:
        vmem_phys = int(pltpu.get_tpu_info().vmem_capacity_bytes)
    except Exception:
        vmem_phys = None
    if vmem_phys is None:
        vmem_phys = (64 if "7" in kind else 128) * 1024 * 1024
    if "v5" in kind:
        max_tile = 128            # v5e: slowest HBM, 128-wide MXU
    elif vmem_phys <= 64 * 1024 * 1024:
        max_tile = 256            # v7x: 64 MiB VMEM per TensorCore
    else:
        max_tile = 512            # v6e: 128 MiB VMEM; 512-row tiles ~85% roofline
    vmem_limit = min(vmem_phys * 3 // 4, 100 * 1024 * 1024)
    return max_tile, int(vmem_limit)


def _attention_row_tile(n_lane, fo_pad, wh_itemsize, *, last, budget, max_tile):
    """VMEM-budget-driven row tile: power of two, divides n_lane, >= 32."""
    # Grid-invariant blocks (double-buffered by BlockSpec): resident Wh + wh2 row.
    resident = 2 * (n_lane * fo_pad * wh_itemsize + n_lane * 4)
    # Streamed per-row bytes (double-buffered): adj(int8) + wh1 + hp [+ logp + attn].
    per_row = 2 * (n_lane * 1 + 4 + fo_pad * 4)
    if last:
        per_row += 2 * (fo_pad * 4 + n_lane * 4)
    avail = max(budget - resident, 0)
    t = min(avail // max(per_row, 1), max_tile, n_lane)
    t = max(32, _pow2_floor(max(int(t), 1)))   # >=32 keeps int8 adj sublane-native
    while t > 128 and n_lane % t:              # tile must divide lane-padded N
        t //= 2
    while t > 32 and n_lane // t < 2:          # >=2 grid steps (megacore on v7x)
        t //= 2
    return int(t)


def _compiler_params(vmem_limit_bytes):
    return pltpu.CompilerParams(
        dimension_semantics=("parallel",),
        vmem_limit_bytes=int(vmem_limit_bytes),
    )


# ------------------------------- Pallas kernels -------------------------------


def _project_kernel(h_ref, w_ref, wa12_ref, wh_ref, f_ref):
    """Wh = h @ W (bf16/f32 MXU path); f = h @ (W@a12) kept in f32 for scores."""
    h = h_ref[...]
    wh = jnp.dot(h.astype(w_ref.dtype), w_ref[...],
                 preferred_element_type=jnp.float32)
    wh_ref[...] = wh.astype(wh_ref.dtype)
    f_ref[...] = jnp.dot(h, wa12_ref[...], preferred_element_type=jnp.float32)


def _masked_softmax_rows(wh1, wh2_row, adj, alpha):
    """pyGAT attention for one row block: leakyrelu(Wh1 + Wh2^T), mask, softmax."""
    e = wh1 + wh2_row                                   # [tr, N] broadcast add
    e = jnp.where(e > 0, e, alpha * e)                  # LeakyReLU(alpha)
    mask = adj.astype(jnp.float32) > 0.0                # adj streamed as int8 mask
    scores = jnp.where(mask, e, _NEG_BIG)
    m = jnp.max(scores, axis=1, keepdims=True)
    p = jnp.exp(scores - m)
    denom = jnp.sum(p, axis=1, keepdims=True)
    # EUP reciprocal (+1 Newton step for f32 accuracy) -> N^2 multiplies, no divides.
    inv = pl.reciprocal(denom, approx=True)
    inv = inv * (2.0 - denom * inv)
    return p * inv                                      # [tr, N] f32


def _gat_mid_kernel(wh1_ref, wh2_ref, adj_ref, wh_ref, hp_ref, *, alpha):
    """Intermediate layer: h' = elu(attn @ Wh). Attention is NOT written out."""
    attn = _masked_softmax_rows(wh1_ref[...], wh2_ref[...], adj_ref[...], alpha)
    hp = jnp.dot(attn.astype(wh_ref.dtype), wh_ref[...],
                 preferred_element_type=jnp.float32)
    # F.elu between layers; clamp so the unselected branch stays finite.
    hp_ref[...] = jnp.where(hp > 0, hp, jnp.exp(jnp.minimum(hp, 0.0)) - 1.0)


def _gat_last_kernel(wh1_ref, wh2_ref, adj_ref, wh_ref,
                     hp_ref, logp_ref, attn_ref, *, alpha, nclass):
    """Final layer: h' (embedding), fused log_softmax over real classes, attn."""
    attn = _masked_softmax_rows(wh1_ref[...], wh2_ref[...], adj_ref[...], alpha)
    hp = jnp.dot(attn.astype(wh_ref.dtype), wh_ref[...],
                 preferred_element_type=jnp.float32)
    hp_ref[...] = hp                     # embedding (no activation on last layer)
    attn_ref[...] = attn
    # Row-wise log_softmax restricted to the first `nclass` (unpadded) columns;
    # padded columns of logp hold garbage and are sliced off in the wrapper.
    col = jax.lax.broadcasted_iota(jnp.int32, hp.shape, 1)
    valid = col < nclass
    z = jnp.where(valid, hp, -1e30)
    m = jnp.max(z, axis=1, keepdims=True)
    s = z - m
    lse = jnp.log(jnp.sum(jnp.where(valid, jnp.exp(s), 0.0), axis=1, keepdims=True))
    logp_ref[...] = s - lse


# --------------------------------- wrappers -----------------------------------


def gat_project(h, W, Wa12, *, row_tile, vmem_limit):
    N, Fi = h.shape
    Fo = W.shape[1]
    wsz = W.dtype.itemsize
    grid = (N // row_tile,)
    cost = pl.CostEstimate(
        flops=2 * N * Fi * (Fo + 2),
        transcendentals=0,
        bytes_accessed=4 * N * Fi + wsz * Fi * Fo + 8 * Fi + wsz * N * Fo + 8 * N,
    )
    return pl.pallas_call(
        _project_kernel,
        out_shape=(jax.ShapeDtypeStruct((N, Fo), W.dtype),       # Wh (matmul dtype)
                   jax.ShapeDtypeStruct((N, 2), jnp.float32)),   # f = [Wh@a1, Wh@a2]
        grid=grid,
        in_specs=[pl.BlockSpec((row_tile, Fi), lambda i: (i, 0)),
                  pl.BlockSpec((Fi, Fo), lambda i: (0, 0)),
                  pl.BlockSpec((Fi, 2), lambda i: (0, 0))],
        out_specs=(pl.BlockSpec((row_tile, Fo), lambda i: (i, 0)),
                   pl.BlockSpec((row_tile, 2), lambda i: (i, 0))),
        compiler_params=_compiler_params(vmem_limit),
        cost_estimate=cost,
    )(h, W, Wa12)


def gat_attention_mid(wh1, wh2_row, adj_mask, Wh, *, alpha, row_tile, vmem_limit):
    N = adj_mask.shape[0]
    Fo = Wh.shape[1]
    wsz = Wh.dtype.itemsize
    grid = (N // row_tile,)
    kernel = functools.partial(_gat_mid_kernel, alpha=alpha)
    cost = pl.CostEstimate(
        flops=2 * N * N * Fo + 8 * N * N,
        transcendentals=N * N + N * Fo,
        bytes_accessed=N * N + 8 * N + wsz * N * Fo + 4 * N * Fo,
    )
    return pl.pallas_call(
        kernel,
        out_shape=jax.ShapeDtypeStruct((N, Fo), jnp.float32),
        grid=grid,
        in_specs=[pl.BlockSpec((row_tile, 1), lambda i: (i, 0)),   # Wh@a1 (row block)
                  pl.BlockSpec((1, N), lambda i: (0, 0)),          # (Wh@a2)^T (full row)
                  pl.BlockSpec((row_tile, N), lambda i: (i, 0)),   # adj mask (int8)
                  pl.BlockSpec((N, Fo), lambda i: (0, 0))],        # Wh (resident)
        out_specs=pl.BlockSpec((row_tile, Fo), lambda i: (i, 0)),
        compiler_params=_compiler_params(vmem_limit),
        cost_estimate=cost,
    )(wh1, wh2_row, adj_mask, Wh)


def gat_attention_last(wh1, wh2_row, adj_mask, Wh, *, alpha, nclass, row_tile,
                       vmem_limit):
    N = adj_mask.shape[0]
    Fo = Wh.shape[1]
    wsz = Wh.dtype.itemsize
    grid = (N // row_tile,)
    kernel = functools.partial(_gat_last_kernel, alpha=alpha, nclass=nclass)
    cost = pl.CostEstimate(
        flops=2 * N * N * Fo + 12 * N * N,
        transcendentals=N * N + N * Fo,
        bytes_accessed=5 * N * N + 8 * N + wsz * N * Fo + 8 * N * Fo,
    )
    return pl.pallas_call(
        kernel,
        out_shape=(jax.ShapeDtypeStruct((N, Fo), jnp.float32),   # embedding (padded)
                   jax.ShapeDtypeStruct((N, Fo), jnp.float32),   # log_softmax (padded)
                   jax.ShapeDtypeStruct((N, N), jnp.float32)),   # attention
        grid=grid,
        in_specs=[pl.BlockSpec((row_tile, 1), lambda i: (i, 0)),
                  pl.BlockSpec((1, N), lambda i: (0, 0)),
                  pl.BlockSpec((row_tile, N), lambda i: (i, 0)),
                  pl.BlockSpec((N, Fo), lambda i: (0, 0))],
        out_specs=(pl.BlockSpec((row_tile, Fo), lambda i: (i, 0)),
                   pl.BlockSpec((row_tile, Fo), lambda i: (i, 0)),
                   pl.BlockSpec((row_tile, N), lambda i: (i, 0))),
        compiler_params=_compiler_params(vmem_limit),
        cost_estimate=cost,
    )(wh1, wh2_row, adj_mask, Wh)


# ---------------------------------- model -------------------------------------


class GATPallas:
    """JAX/Pallas port of the PyTorch GAT module (eval mode)."""

    def __init__(self, nfeat, nhid, nclass, num_layers, dropout, alpha, nheads,
                 key, matmul_dtype=jnp.bfloat16):
        self.dropout = dropout     # identity in eval mode
        self.alpha = alpha
        self.num_layers = num_layers
        self.nheads = nheads       # unused by this GAT variant (concat=False layers)
        self.nclass = nclass
        self.matmul_dtype = matmul_dtype

        # Unpadded f32 params (used by the pure-JAX reference).
        self.Ws, self.a1s, self.a2s = [], [], []
        # Lane-padded kernel params: W in matmul dtype, Wa12 = W@[a1 a2] in f32.
        self.Ws_pad, self.Wa12s_pad = [], []

        for l in range(num_layers):
            if l == 0:
                fin, fout = nfeat, nhid
            elif l == num_layers - 1:
                fin, fout = nhid, nclass
            else:
                fin, fout = nhid, nhid
            key, kw, ka = jax.random.split(key, 3)
            # xavier-uniform-style deterministic init (gain=1.414, as in pyGAT)
            limit_w = 1.414 * (6.0 / (fin + fout)) ** 0.5
            W = jax.random.uniform(kw, (fin, fout), jnp.float32, -limit_w, limit_w)
            limit_a = 1.414 * (6.0 / (2 * fout + 1)) ** 0.5
            a = jax.random.uniform(ka, (2 * fout,), jnp.float32, -limit_a, limit_a)
            a1 = a[:fout].reshape(fout, 1)
            a2 = a[fout:].reshape(fout, 1)
            self.Ws.append(W)
            self.a1s.append(a1)
            self.a2s.append(a2)

            fin_pad = _round_up(fin, LANE)
            fout_pad = _round_up(fout, LANE)
            W_pad = (jnp.zeros((fin_pad, fout_pad), matmul_dtype)
                     .at[:fin, :fout].set(W.astype(matmul_dtype)))
            # Precompute Wa12 = W @ [a1 a2] so f = h @ Wa12 is independent of the
            # Wh matmul (no serial MXU dependency) and stays f32-precise.
            Wa12 = W @ jnp.concatenate([a1, a2], axis=1)              # [fin, 2]
            Wa12_pad = jnp.zeros((fin_pad, 2), jnp.float32).at[:fin, :].set(Wa12)
            self.Ws_pad.append(W_pad)
            self.Wa12s_pad.append(Wa12_pad)

    def __call__(self, x, adj, node_labels):
        # F.dropout(training=False) == identity
        N, nfeat = x.shape
        max_tile, vmem_limit = _tpu_config()
        budget = int(vmem_limit * 0.9)
        wh_itemsize = jnp.dtype(self.matmul_dtype).itemsize

        n_lane = _round_up(N, LANE)     # lane-dense adj / attention width
        fo_last = self.Ws_pad[-1].shape[1]
        tile_last = _attention_row_tile(n_lane, fo_last, wh_itemsize,
                                        last=True, budget=budget, max_tile=max_tile)
        if self.num_layers > 1:
            fo_mid = self.Ws_pad[0].shape[1]
            tile_mid = _attention_row_tile(n_lane, fo_mid, wh_itemsize,
                                           last=False, budget=budget,
                                           max_tile=max_tile)
        else:
            tile_mid = tile_last
        n_pad = n_lane                  # tiles divide n_lane by construction

        fin_pad0 = self.Ws_pad[0].shape[0]
        x_pad = jnp.zeros((n_pad, fin_pad0), jnp.float32).at[:N, :nfeat].set(x)
        # adj streamed as an int8 binary mask (4x less HBM / VMEM than f32).
        adj_mask = (jnp.zeros((n_pad, n_pad), jnp.int8)
                    .at[:N, :N].set((adj > 0).astype(jnp.int8)))

        for l in range(self.num_layers - 1):
            Wh, f = gat_project(x_pad, self.Ws_pad[l], self.Wa12s_pad[l],
                                row_tile=tile_mid, vmem_limit=vmem_limit)
            wh1 = f[:, 0:1]            # [N_pad, 1]
            wh2_row = f[:, 1:2].T      # [1, N_pad] -- transpose hoisted out of tiles
            x_pad = gat_attention_mid(wh1, wh2_row, adj_mask, Wh,
                                      alpha=self.alpha, row_tile=tile_mid,
                                      vmem_limit=vmem_limit)

        Wh, f = gat_project(x_pad, self.Ws_pad[-1], self.Wa12s_pad[-1],
                            row_tile=tile_last, vmem_limit=vmem_limit)
        wh1 = f[:, 0:1]
        wh2_row = f[:, 1:2].T
        hp_pad, logp_pad, attn_pad = gat_attention_last(
            wh1, wh2_row, adj_mask, Wh,
            alpha=self.alpha, nclass=self.nclass, row_tile=tile_last,
            vmem_limit=vmem_limit)

        embedding = hp_pad[:N, :self.nclass]
        logp = logp_pad[:N, :self.nclass]
        attn_val = attn_pad[:N, :N]
        return embedding, logp, attn_val


# ----------------------------- pure-JAX reference ------------------------------


def _ref_layer(h, W, a1, a2, adj, alpha, apply_elu):
    Wh = h @ W
    e = Wh @ a1 + (Wh @ a2).T
    e = jnp.where(e > 0, e, alpha * e)
    scores = jnp.where(adj > 0, e, -9e15)
    attn = jax.nn.softmax(scores, axis=1)
    hp = attn @ Wh
    if apply_elu:
        hp = jnp.where(hp > 0, hp, jnp.expm1(hp))
    return hp, attn


def _ref_forward(model, x, adj):
    attn = None
    for l in range(model.num_layers - 1):
        x, attn = _ref_layer(x, model.Ws[l], model.a1s[l], model.a2s[l], adj,
                             model.alpha, True)
    x, attn = _ref_layer(x, model.Ws[-1], model.a1s[-1], model.a2s[-1], adj,
                         model.alpha, False)
    return x, jax.nn.log_softmax(x, axis=1), attn


# ------------------------------------ main -------------------------------------


if __name__ == "__main__":
    key = jax.random.PRNGKey(0)
    k_x, k_adj, k_params = jax.random.split(key, 3)

    N, nfeat, nhid, nclass = 16, 8, 32, 8
    num_layers, dropout, alpha, nheads = 3, 0.5, 0.2, 4

    x = jax.random.normal(k_x, (N, nfeat), jnp.float32)
    adj = (jax.random.uniform(k_adj, (N, N)) > 0.7).astype(jnp.float32)
    adj = jnp.maximum(adj, jnp.eye(N, dtype=jnp.float32))  # self loops
    node_labels = jnp.zeros((N,), jnp.int32)                # unused by forward

    ref_emb = ref_logp = ref_attn = None

    # --- f32 matmul path: tight numerical parity with the pure-JAX reference ---
    model_f32 = GATPallas(nfeat, nhid, nclass, num_layers, dropout, alpha, nheads,
                          k_params, matmul_dtype=jnp.float32)
    emb32, logp32, attn32 = model_f32(x, adj, node_labels)
    jax.block_until_ready((emb32, logp32, attn32))
    ref_emb, ref_logp, ref_attn = _ref_forward(model_f32, x, adj)
    assert emb32.shape == (N, nclass) and logp32.shape == (N, nclass)
    assert attn32.shape == (N, N)
    assert jnp.allclose(emb32, ref_emb, atol=1e-3, rtol=1e-3), "embedding mismatch"
    assert jnp.allclose(logp32, ref_logp, atol=1e-3, rtol=1e-3), "log_softmax mismatch"
    assert jnp.allclose(attn32, ref_attn, atol=1e-3, rtol=1e-3), "attention mismatch"

    # --- bf16 MXU fast path (default): looser tolerance vs the f32 reference ---
    model_bf16 = GATPallas(nfeat, nhid, nclass, num_layers, dropout, alpha, nheads,
                           k_params)  # matmul_dtype=jnp.bfloat16
    emb16, logp16, attn16 = model_bf16(x, adj, node_labels)
    jax.block_until_ready((emb16, logp16, attn16))
    assert emb16.shape == (N, nclass) and logp16.shape == (N, nclass)
    assert attn16.shape == (N, N)
    assert jnp.allclose(emb16, ref_emb, atol=1e-1, rtol=1e-1), "bf16 embedding mismatch"
    assert jnp.allclose(logp16, ref_logp, atol=1e-1, rtol=1e-1), "bf16 log_softmax mismatch"
    assert jnp.allclose(attn16, ref_attn, atol=1e-1, rtol=1e-1), "bf16 attention mismatch"

    print("KERNEL_OK")
</pallas_src>

<mosaic_0001>
module attributes {stable_mosaic.version = 11 : i64} {
  func.func @_project_kernel(%arg0: i32, %arg1: memref<64x128xf32, #tpu.memory_space<vmem>>, %arg2: memref<128x128xf32, #tpu.memory_space<vmem>>, %arg3: memref<128x2xf32, #tpu.memory_space<vmem>>, %arg4: memref<64x128xf32, #tpu.memory_space<vmem>>, %arg5: memref<64x2xf32, #tpu.memory_space<vmem>>) attributes {dimension_semantics = [#tpu.dimension_semantics<parallel>], iteration_bounds = array<i64: 2>, scalar_prefetch = 0 : i64, scratch_operands = 0 : i64, tpu.core_type = #tpu.core_type<tc>, window_params = [{transform_indices = @transform_0, window_bounds = array<i64: 64, 128>}, {pipeline_mode = #tpu.pipeline_mode<synchronous>, transform_indices = @transform_1, window_bounds = array<i64: 128, 128>}, {pipeline_mode = #tpu.pipeline_mode<synchronous>, transform_indices = @transform_2, window_bounds = array<i64: 128, 2>}, {transform_indices = @transform_3, window_bounds = array<i64: 64, 128>}, {transform_indices = @transform_4, window_bounds = array<i64: 64, 2>}]} {
    %c0 = arith.constant 0 : index
    %c0_0 = arith.constant 0 : index
    %0 = vector.load %arg1[%c0, %c0_0] : memref<64x128xf32, #tpu.memory_space<vmem>>, vector<64x128xf32>
    %c0_1 = arith.constant 0 : index
    %c0_2 = arith.constant 0 : index
    %1 = vector.load %arg2[%c0_1, %c0_2] : memref<128x128xf32, #tpu.memory_space<vmem>>, vector<128x128xf32>
    %cst = arith.constant dense<0.000000e+00> : vector<64x128xf32>
    %2 = tpu.matmul %0, %1, %cst {dimension_numbers = #tpu.dot_dimension_numbers<[1], [0], [0], [1], [0, 0, 1, 1], [], []>} : vector<64x128xf32>, vector<128x128xf32>, vector<64x128xf32> -> vector<64x128xf32>
    %c0_3 = arith.constant 0 : index
    %c0_4 = arith.constant 0 : index
    %3 = vector.load %arg4[%c0_3, %c0_4] : memref<64x128xf32, #tpu.memory_space<vmem>>, vector<64x128xf32>
    tpu.vector_store %arg4[%c0_3, %c0_4], %2 {strides = array<i32>} : memref<64x128xf32, #tpu.memory_space<vmem>>, vector<64x128xf32>,
    %c0_5 = arith.constant 0 : index
    %c0_6 = arith.constant 0 : index
    %4 = vector.load %arg3[%c0_5, %c0_6] : memref<128x2xf32, #tpu.memory_space<vmem>>, vector<128x2xf32>
    %cst_7 = arith.constant dense<0.000000e+00> : vector<64x2xf32>
    %5 = tpu.matmul %0, %4, %cst_7 {dimension_numbers = #tpu.dot_dimension_numbers<[1], [0], [0], [1], [0, 0, 1, 1], [], []>} : vector<64x128xf32>, vector<128x2xf32>, vector<64x2xf32> -> vector<64x2xf32>
    %c0_8 = arith.constant 0 : index
    %c0_9 = arith.constant 0 : index
    %6 = vector.load %arg5[%c0_8, %c0_9] : memref<64x2xf32, #tpu.memory_space<vmem>>, vector<64x2xf32>
    tpu.vector_store %arg5[%c0_8, %c0_9], %5 {strides = array<i32>} : memref<64x2xf32, #tpu.memory_space<vmem>>, vector<64x2xf32>,
    return
  }
  func.func @transform_0(%arg0: i32) -> (i32, i32) {
    %c0_i32 = arith.constant 0 : i32
    %c0_i32_0 = arith.constant 0 : i32
    return %arg0, %c0_i32 : i32, i32
  }
  func.func @transform_1(%arg0: i32) -> (i32, i32) {
    %c0_i32 = arith.constant 0 : i32
    %c0_i32_0 = arith.constant 0 : i32
    %c0_i32_1 = arith.constant 0 : i32
    return %c0_i32, %c0_i32_0 : i32, i32
  }
  func.func @transform_2(%arg0: i32) -> (i32, i32) {
    %c0_i32 = arith.constant 0 : i32
    %c0_i32_0 = arith.constant 0 : i32
    %c0_i32_1 = arith.constant 0 : i32
    return %c0_i32, %c0_i32_0 : i32, i32
  }
  func.func @transform_3(%arg0: i32) -> (i32, i32) {
    %c0_i32 = arith.constant 0 : i32
    %c0_i32_0 = arith.constant 0 : i32
    return %arg0, %c0_i32 : i32, i32
  }
  func.func @transform_4(%arg0: i32) -> (i32, i32) {
    %c0_i32 = arith.constant 0 : i32
    %c0_i32_0 = arith.constant 0 : i32
    return %arg0, %c0_i32 : i32, i32
  }
}

</mosaic_0001>

<bundles_post_ra>
// kernel: tpu_custom_call.1
= control target key start
LH: loop header
LB: loop body
LE: loop exit
PB: predicated region body
PF: predicated region fallthrough
CT: control target
= control target key end

     0   :  { %10 = vsyncpa [#allocation3], 0  ;;  %s919_s0 = inlined_call_operand.vmem [shape: f32[128,128], index: 0, kind: input, shape index: {}]   ;;  %s920_s1 = inlined_call_operand.hbm [shape: f32[128,128], index: 1, kind: input, shape index: {}]   ;;  %s921_s2 = inlined_call_operand.vmem [shape: f32[128,2], index: 2, kind: input, shape index: {}]   ;;  %s922_s3 = inlined_call_operand.hbm [shape: f32[128,128], index: 3, kind: output, shape index: {0}]   ;;  %s923_s4 = inlined_call_operand.vmem [shape: f32[128,2], index: 4, kind: output, shape index: {1}]  }
   0x1   :  { %11 = vsyncpa [#allocation4], 0 }
   0x2   :  { %13 = vsyncpa [#allocation4 + $0x1], 0  ;;  %s724_s15 = smov 0   ;;  %s726_s16 = smov 0  }
   0x3   :  { %s728_s17 = smov 0   ;;  %s730_s18 = smov 0  }
   0x4 LB: > { %s745_s19 = sadd.s32 4294967295, %s692_s18   ;;  %s493_s20 = sadd.s32 4294967294, %s692_s18   ;;  %s692_s18 = sphi %s730_s18, %s929_s18   ;;  %s688_s17 = sphi %s728_s17, %s928_s17   ;;  %s684_s16 = sphi %s726_s16, %s927_s16   ;;  %s680_s15 = sphi %s724_s15, %s926_s15  }
   0x5   : > { %s749_s21 = sadd.s32 1, %s692_s18   ;;  %s94_s22 = sadd.s32 1, %s688_s17 }
   0x6   : > { %s91_s23 = ssub.s32 %s692_s18, %s749_s21  ;;  %p104_p0 = scmp.ne.s32.totalorder %s688_s17, %s684_s16 }
   0x7   : > { %p92_p1 = scmp.eq.s32.totalorder %s91_s23, 0  ;;  %p105_p2 = scmp.eq.s32.totalorder %s745_s19, 1 }
   0x8   : > { %p110_p3 = scmp.ne.s32.totalorder %s684_s16, %s680_s15  ;;  %p111_p4 = scmp.eq.s32.totalorder %s493_s20, 1 }
   0x9   : > { %s760_s24 = scalar_select %p92_p1, %s688_s17, %s94_s22  }
   0xa   : > { %p762_p5 = por %p105_p2, %p104_p0  ;;  %p766_p6 = por %p111_p4, %p110_p3 }
   0xb   : > { %p494_p7 = scmp.ge.s32.totalorder %s692_s18, 1  ;;  %p144_p8 = scmp.lt.s32.totalorder %s692_s18, 3 }
   0xc   : > { %p556_p9 = scmp.eq.s32.totalorder %s745_s19, 0  ;;  %s155_s29 = sshll.u32 %s920_s1, 4  ;;  %s156_s29 = int_to_ptr.hbm [resolvable:$true] %s155_s29 }
   0xd   : > { %p145_p10 = pnand %p494_p7, %p144_p8  ;;  %s694_s30 = smov [#allocation2]  }
   0xe   : > { %s157_s5 = sshll.u32 %s694_s30, 4  ;;  %s695_s6 = smov 128   ;;  %s158_s5 = int_to_ptr.vmem [resolvable:$true] %s157_s5 }
   0xf   : > { %p548_p11 = pneg %p145_p10  ;;  %s696_s7 = smov 8  }
  0x10   : > { %185 = sbr.rel (%p145_p10) target bundleno = 215 (0xd7), region = 32 }
  0x11   : > { %p549_p12 = pnand %p556_p9, %p548_p11 }
  0x13   : > { %551 = dma.hbm_to_vmem [thread:$0]  (!%p549_p12), %s156_s29, 2048, %s158_s5, [#allocation3], %s695_s6, %s695_s6, %s696_s7  }
  0x15   : > { %671 = dma.done.wait (%p556_p9), [#allocation3], 2048  }
  0x16   : > { %673 = vsyncadd (%p556_p9), [#allocation3], 4294965248  ;;  %v253_v0 = vld [vmem:[#allocation2 + $0x78] sm:$0xff]  ;;  %v252_v2 = vld [vmem:[#allocation2 + $0x70] sm:$0xff]  ;;  %s500_s7 = sshll.u32 %s745_s19, 3  ;;  %s207_s12 = sand.u32 1, %s684_s16  }
  0x17   : > { %v318_v1 = vld [vmem:[%s921_s2 + $0x78] sm:$0xff]  ;;  %510 = vmatpush.msra.mxu2 %v253_v0  ;;  %v317_v3 = vld [vmem:[%s921_s2 + $0x70] sm:$0xff]  ;;  %v251_v4 = vld [vmem:[#allocation2 + $0x68] sm:$0xff]  ;;  %254 = vmatpush.msra.mxu0 %v253_v0  ;;  %p218_p13 = scmp.lt.s32.totalorder %s500_s7, 15  ;;  %s499_s13 = sshll.u32 %s207_s12, 6  ;;  %vm360_vm0 = vcmask 15360  }
  0x18   : > { %526 = vmatpush.msra.mxu3 %v318_v1  ;;  %v316_v5 = vld [vmem:[%s921_s2 + $0x68] sm:$0xff]  ;;  %319 = vmatpush.msra.mxu1 %v318_v1  ;;  %v250_v6 = vld [vmem:[#allocation2 + $0x60] sm:$0xff]  ;;  %v249_v8 = vld [vmem:[#allocation2 + $0x58] sm:$0xff]  ;;  %s859_s23 = scalar_lea.vmem [#allocation5], %s499_s13  ;;  %s646_s11 = scalar_lea.hbm %s922_s3, 128 }
  0x19   : > { %511 = vmatpush.msra.mxu2 %v252_v2  ;;  %v315_v7 = vld [vmem:[%s921_s2 + $0x60] sm:$0xff]  ;;  %255 = vmatpush.msra.mxu0 %v252_v2  ;;  %v314_v9 = vld [vmem:[%s921_s2 + $0x58] sm:$0xff]  ;;  %v248_v10 = vld [vmem:[#allocation2 + $0x50] sm:$0xff]  ;;  %s931_s7 = smov (!%p218_p13, %s500_s7), 15  ;;  %s387_s30 = sshll.u32 %s859_s23, 4  ;;  %s388_s30 = int_to_ptr.vmem [resolvable:$true] %s387_s30 }
  0x1a   : > { %527 = vmatpush.msra.mxu3 %v317_v3  ;;  %320 = vmatpush.msra.mxu1 %v317_v3  ;;  %v313_v11 = vld [vmem:[%s921_s2 + $0x50] sm:$0xff]  ;;  %v247_v12 = vld [vmem:[#allocation2 + $0x48] sm:$0xff]  ;;  %v246_v14 = vld [vmem:[#allocation2 + $0x40] sm:$0xff]  ;;  %s501_s27 = sshll.u32 %s931_s7, 3  ;;  %s509_s7 = sshll.u32 %s745_s19, 6 }
  0x1b   : > { %512 = vmatpush.msra.mxu2 %v251_v4  ;;  %256 = vmatpush.msra.mxu0 %v251_v4  ;;  %v312_v13 = vld [vmem:[%s921_s2 + $0x48] sm:$0xff]  ;;  %v311_v15 = vld [vmem:[%s921_s2 + $0x40] sm:$0xff]  ;;  %v245_v16 = vld [vmem:[#allocation2 + $0x38] sm:$0xff]  ;;  %s836_s9 = scalar_lea.vmem %s919_s0, %s501_s27  ;;  %s857_s22 = scalar_lea.vmem %s923_s4, %s501_s27 }
  0x1c   : > { %528 = vmatpush.msra.mxu3 %v316_v5  ;;  %321 = vmatpush.msra.mxu1 %v316_v5  ;;  %v310_v17 = vld [vmem:[%s921_s2 + $0x38] sm:$0xff]  ;;  %v244_v18 = vld [vmem:[#allocation2 + $0x30] sm:$0xff]  ;;  %v243_v20 = vld [vmem:[#allocation2 + $0x28] sm:$0xff]  ;;  %s386_s29 = scalar_lea.hbm %s922_s3, %s509_s7  ;;  %s370_s19 = scalar_lea.sflag [#allocation4], %s207_s12 }
  0x1d   : > { %513 = vmatpush.msra.mxu2 %v250_v6  ;;  %257 = vmatpush.msra.mxu0 %v250_v6  ;;  %v309_v19 = vld [vmem:[%s921_s2 + $0x30] sm:$0xff]  ;;  %v308_v21 = vld [vmem:[%s921_s2 + $0x28] sm:$0xff]  ;;  %v242_v22 = vld [vmem:[#allocation2 + $0x20] sm:$0xff]  ;;  %s389_s5 = sshll.u32 %s386_s29, 4  ;;  %s390_s5 = int_to_ptr.hbm [resolvable:$true] %s389_s5 }
  0x1e   : > { %529 = vmatpush.msra.mxu3 %v315_v7  ;;  %322 = vmatpush.msra.mxu1 %v315_v7  ;;  %v307_v23 = vld [vmem:[%s921_s2 + $0x20] sm:$0xff]  ;;  %v241_v24 = vld [vmem:[#allocation2 + $0x18] sm:$0xff]  ;;  %v240_v26 = vld [vmem:[#allocation2 + $0x10] sm:$0xff]  ;;  %s640_s6 = sshra.s32 %s390_s5, 4  ;;  %s641_s6 = int_to_ptr.hbm [resolvable:$true] %s640_s6 }
  0x1f   : > { %514 = vmatpush.msra.mxu2 %v249_v8  ;;  %258 = vmatpush.msra.mxu0 %v249_v8  ;;  %v306_v25 = vld [vmem:[%s921_s2 + $0x18] sm:$0xff]  ;;  %v305_v27 = vld [vmem:[%s921_s2 + $0x10] sm:$0xff]  ;;  %v239_v28 = vld [vmem:[#allocation2 + $0x8] sm:$0xff]  ;;  %s642_s8 = scalar_lea.hbm %s641_s6, 64  ;;  %p647_p3 = scmp.lt.s32.totalorder %s641_s6, %s922_s3 }
  0x20   : > { %530 = vmatpush.msra.mxu3 %v314_v9  ;;  %323 = vmatpush.msra.mxu1 %v314_v9  ;;  %v304_v29 = vld [vmem:[%s921_s2 + $0x8] sm:$0xff]  ;;  %v238_v30 = vld [vmem:[#allocation2] sm:$0xff]  ;;  %v236_v36 = vld [vmem:[%s836_s9 + $0x30] sm:$0xff]  ;;  %p643_p0 = scmp.ne.s32.totalorder %s641_s6, %s642_s8  ;;  %p648_p4 = scmp.lt.s32.totalorder %s646_s11, %s642_s8 }
  0x21   : > { %515 = vmatpush.msra.mxu2 %v248_v10  ;;  %259 = vmatpush.msra.mxu0 %v248_v10  ;;  %v303_v31 = vld [vmem:[%s921_s2] sm:$0xff]  ;;  %v235_v34 = vld [vmem:[%s836_s9 + $0x28] sm:$0xff]  ;;  %v232_v37 = vld [vmem:[%s836_s9 + $0x10] sm:$0xff] }
  0x22   : > { %531 = vmatpush.msra.mxu3 %v313_v11  ;;  %324 = vmatpush.msra.mxu1 %v313_v11  ;;  %v234_v32 = vld [vmem:[%s836_s9 + $0x20] sm:$0xff]  ;;  %v231_v35 = vld [vmem:[%s836_s9 + $0x8] sm:$0xff]  ;;  %v237_v38 = vld [vmem:[%s836_s9 + $0x38] sm:$0xff]  ;;  %p644_p1 = pnand %p643_p0, %p762_p5  ;;  %p649_p7 = por %p648_p4, %p647_p3 }
  0x23   : > { %516 = vmatpush.msra.mxu2 %v247_v12  ;;  %260 = vmatpush.msra.mxu0 %v247_v12  ;;  %v230_v33 = vld [vmem:[%s836_s9] sm:$0xff]  ;;  %v233_v39 = vld [vmem:[%s836_s9 + $0x18] sm:$0xff] }
  0x24   : > { %532 = vmatpush.msra.mxu3 %v312_v13  ;;  %325 = vmatpush.msra.mxu1 %v312_v13  ;;  %p645_p2 = pneg %p644_p1 }
  0x25   : > { %517 = vmatpush.msra.mxu2 %v246_v14  ;;  %261 = vmatpush.msra.mxu0 %v246_v14 }
  0x26   : > { %533 = vmatpush.msra.mxu3 %v311_v15  ;;  %326 = vmatpush.msra.mxu1 %v311_v15  ;;  %p650_p8 = pnand %p649_p7, %p645_p2 }
  0x27   : > { %518 = vmatpush.msra.mxu2 %v245_v16  ;;  %262 = vmatpush.msra.mxu0 %v245_v16 }
  0x28   : > { %534 = vmatpush.msra.mxu3 %v310_v17  ;;  %327 = vmatpush.msra.mxu1 %v310_v17 }
  0x29   : > { %519 = vmatpush.msra.mxu2 %v244_v18  ;;  %263 = vmatpush.msra.mxu0 %v244_v18 }
  0x2a   : > { %535 = vmatpush.msra.mxu3 %v309_v19  ;;  %328 = vmatpush.msra.mxu1 %v309_v19 }
  0x2b   : > { %520 = vmatpush.msra.mxu2 %v243_v20  ;;  %264 = vmatpush.msra.mxu0 %v243_v20 }
  0x2c   : > { %536 = vmatpush.msra.mxu3 %v308_v21  ;;  %329 = vmatpush.msra.mxu1 %v308_v21 }
  0x2d   : > { %521 = vmatpush.msra.mxu2 %v242_v22  ;;  %265 = vmatpush.msra.mxu0 %v242_v22 }
  0x2e   : > { %537 = vmatpush.msra.mxu3 %v307_v23  ;;  %330 = vmatpush.msra.mxu1 %v307_v23 }
  0x2f   : > { %522 = vmatpush.msra.mxu2 %v241_v24  ;;  %266 = vmatpush.msra.mxu0 %v241_v24 }
  0x30   : > { %538 = vmatpush.msra.mxu3 %v306_v25  ;;  %331 = vmatpush.msra.mxu1 %v306_v25 }
  0x31   : > { %523 = vmatpush.msra.mxu2 %v240_v26  ;;  %267 = vmatpush.msra.mxu0 %v240_v26 }
  0x32   : > { %539 = vmatpush.msra.mxu3 %v305_v27  ;;  %332 = vmatpush.msra.mxu1 %v305_v27 }
  0x33   : > { %524 = vmatpush.msra.mxu2 %v239_v28  ;;  %268 = vmatpush.msra.mxu0 %v239_v28 }
  0x34   : > { %540 = vmatpush.msra.mxu3 %v304_v29  ;;  %333 = vmatpush.msra.mxu1 %v304_v29 }
  0x35   : > { %525 = vmatpush.msra.mxu2 %v238_v30  ;;  %269 = vmatpush.msra.mxu0 %v238_v30 }
  0x36   : > { %541 = vmatpush.msra.mxu3 %v303_v31  ;;  %282 = vmatmul.f32.vlgmr.msra.gmra.mxu2 %v234_v32 }
  0x37   : > { %347 = vmatmul.f32.vlgmr.msra.gmra.mxu3 %v234_v32  ;;  %334 = vmatpush.msra.mxu1 %v303_v31 }
  0x38   : > { %270 = vmatmul.f32.vlgmr.msra.gmra.mxu0 %v230_v33  ;;  %335 = vmatmul.f32.vlgmr.msra.gmra.mxu1 %v230_v33 }
  0x3e   : > { %285 = vmatmul.f32.gmra.mxu2 %v235_v34 }
  0x3f   : > { %350 = vmatmul.f32.gmra.mxu3 %v235_v34 }
  0x40   : > { %273 = vmatmul.f32.gmra.mxu0 %v231_v35  ;;  %338 = vmatmul.f32.gmra.mxu1 %v231_v35 }
  0x46   : > { %288 = vmatmul.f32.gmra.mxu2 %v236_v36 }
  0x47   : > { %353 = vmatmul.f32.gmra.mxu3 %v236_v36 }
  0x48   : > { %276 = vmatmul.f32.gmra.mxu0 %v232_v37  ;;  %341 = vmatmul.f32.gmra.mxu1 %v232_v37 }
  0x4e   : > { %291 = vmatmul.f32.gmra.mxu2 %v237_v38 }
  0x4f   : > { %356 = vmatmul.f32.gmra.mxu3 %v237_v38 }
  0x50   : > { %279 = vmatmul.f32.gmra.mxu0 %v233_v39  ;;  %344 = vmatmul.f32.gmra.mxu1 %v233_v39 }
  0xb5   : > { %v271_v40 = vpop.f32.mrf.mxu0  ;;  %v336_v41 = vpop.f32.mrf.mxu1 }
  0xb6   : > { %295 = vst [vmem:[%s859_s23] sm:$0xff] %v271_v40 }
  0xb7   : > { %361 = vst.msk [vmem:[%s857_s22] sm:$0xff] %vm360_vm0, %v336_v41 }
  0xb9   : > { %v283_v42 = vpop.f32.mrf.mxu2 }
  0xba   : > { %v348_v43 = vpop.f32.mrf.mxu3  ;;  %299 = vst [vmem:[%s859_s23 + $0x20] sm:$0xff] %v283_v42 }
  0xbb   : > { %365 = vst.msk [vmem:[%s857_s22 + $0x20] sm:$0xff] %vm360_vm0, %v348_v43 }
  0xbd   : > { %v274_v44 = vpop.f32.mrf.mxu0  ;;  %v339_v45 = vpop.f32.mrf.mxu1 }
  0xbe   : > { %296 = vst [vmem:[%s859_s23 + $0x8] sm:$0xff] %v274_v44 }
  0xbf   : > { %362 = vst.msk [vmem:[%s857_s22 + $0x8] sm:$0xff] %vm360_vm0, %v339_v45 }
  0xc1   : > { %v286_v46 = vpop.f32.mrf.mxu2 }
  0xc2   : > { %v351_v47 = vpop.f32.mrf.mxu3  ;;  %300 = vst [vmem:[%s859_s23 + $0x28] sm:$0xff] %v286_v46 }
  0xc3   : > { %366 = vst.msk [vmem:[%s857_s22 + $0x28] sm:$0xff] %vm360_vm0, %v351_v47 }
  0xc5   : > { %v277_v48 = vpop.f32.mrf.mxu0  ;;  %v342_v49 = vpop.f32.mrf.mxu1 }
  0xc6   : > { %297 = vst [vmem:[%s859_s23 + $0x10] sm:$0xff] %v277_v48 }
  0xc7   : > { %363 = vst.msk [vmem:[%s857_s22 + $0x10] sm:$0xff] %vm360_vm0, %v342_v49 }
  0xc9   : > { %v289_v50 = vpop.f32.mrf.mxu2 }
  0xca   : > { %v354_v51 = vpop.f32.mrf.mxu3  ;;  %301 = vst [vmem:[%s859_s23 + $0x30] sm:$0xff] %v289_v50 }
  0xcb   : > { %367 = vst.msk [vmem:[%s857_s22 + $0x30] sm:$0xff] %vm360_vm0, %v354_v51 }
  0xcd   : > { %v280_v52 = vpop.f32.mrf.mxu0  ;;  %v345_v53 = vpop.f32.mrf.mxu1 }
  0xce   : > { %298 = vst [vmem:[%s859_s23 + $0x18] sm:$0xff] %v280_v52 }
  0xcf   : > { %364 = vst.msk [vmem:[%s857_s22 + $0x18] sm:$0xff] %vm360_vm0, %v345_v53 }
  0xd1   : > { %v292_v54 = vpop.f32.mrf.mxu2 }
  0xd2   : > { %v357_v55 = vpop.f32.mrf.mxu3  ;;  %302 = vst [vmem:[%s859_s23 + $0x38] sm:$0xff] %v292_v54 }
  0xd3   : > { %368 = vst.msk [vmem:[%s857_s22 + $0x38] sm:$0xff] %vm360_vm0, %v357_v55 }
  0xd4   : > { %653 = shalt.err (!%p650_p8)
}
  0xd5   : > { %s697_s12 = smov 128   ;;  %s698_s20 = smov 8  }
  0xd6   : > { %546 = dma.vmem_to_hbm [thread:$0]  (%p762_p5), %s388_s30, 1024, %s390_s5, %s370_s19, %s697_s12, %s697_s12, %s698_s20  }
  0xd7 PF: > { %p558_p9 = scmp.ge.s32.totalorder %s692_s18, 2  ;;  %s408_s22 = sand.u32 1, %s680_s15  }
  0xd8   : > { %s409_s23 = scalar_lea.sflag [#allocation4], %s408_s22 }
  0xd9   : > { %p553_p10 = pnand %p558_p9, %p766_p6 }
  0xdb   : > { %p554_p11 = pneg %p553_p10 }
  0xdd   : > { %675 = dma.done.wait (%p554_p11), %s409_s23, 1024  }
  0xde   : > { %677 = vsyncadd (%p554_p11), %s409_s23, 4294966272  ;;  %p16_p12 = scmp.ge.s32.totalorder %s749_s21, 4   ;;  %s926_s15 = smov %s684_s16 }
  0xdf   : > { %s927_s16 = smov %s688_s17  ;;  %s928_s17 = smov %s760_s24 }
  0xe0   : > { %s929_s18 = smov %s749_s21  ;;  %18 = sbr.rel (!%p16_p12) target bundleno = 4 (0x4), region = 84 }
  0xe5   :  { %423 = vsyncpa [#allocation3], 1 }
  0xe6   :  { %425 = vsyncpa [#allocation3 + $0x1], 1 }
  0xe7   :  { %426 = vsyncpa [#allocation4], 1 }
  0xe8   :  { %428 = vsyncpa [#allocation4 + $0x1], 1 }

</bundles_post_ra>
